<compile_context>
chip_gen: v7x
topology: tpu7x:2x2x1
jax: 0.10.0
libtpu: 0.0.40
codegen_flags: <defaults>
</compile_context>

<pallas_src>
import functools

import jax
import jax.numpy as jnp
from jax import lax
from jax.experimental import pallas as pl
from jax.experimental.pallas import tpu as pltpu

EPS = 1e-5


def _block_lbp_kernel(x_ref, wcat_ref, w1_ref, b1_ref, scale_ref, shift_ref,
                      o_ref, patches_ref, *, H, W):
    """Fused BlockLBP body for one batch element.

    x_ref:       (1, C, H*W)   raw input (channel-major, spatial on lanes)
    wcat_ref:    (K, 9*C)      im2col 3x3 ConvLBP weights
    w1_ref:      (C, K)        1x1 conv weights
    b1_ref:      (C, 1)        1x1 conv bias
    scale_ref:   (C, 1)        BN scale = gamma * rsqrt(var + eps)
    shift_ref:   (C, 1)        BN shift = beta - mean * scale
    o_ref:       (1, C, H*W)   output
    patches_ref: (9*C, H*W)    VMEM scratch: im2col patch matrix
    """
    C = x_ref.shape[1]
    HW = H * W

    x = x_ref[0]                                       # (C, HW) raw residual
    xn = x * scale_ref[...] + shift_ref[...]           # BatchNorm (stats hoisted)

    # Flat spatial index + column index used for the conv border masks.
    pos = lax.broadcasted_iota(jnp.int32, (1, HW), 1)
    if W & (W - 1) == 0:
        col = pos & (W - 1)                            # pos % W (power-of-two W)
    else:
        col = lax.rem(pos, W)

    # Build the im2col patch matrix:
    #   patches[t*C + c, p] = xn[c, p + oy*W + ox]  (0 outside the image),
    # for tap t = (oy+1)*3 + (ox+1)  -- matches a padding=1 cross-correlation.
    t = 0
    for oy in (-1, 0, 1):
        for ox in (-1, 0, 1):
            s = oy * W + ox
            if s == 0:
                tap = xn
            else:
                tap = pltpu.roll(xn, (-s) % HW, 1)     # tap[:, p] = xn[:, p+s] (mod HW)
                valid = ((pos >= (-oy) * W) & (pos < (H - oy) * W) &   # source row in range
                         (col >= -ox) & (col < W - ox))                # source col in range
                tap = jnp.where(valid, tap, 0.0)
            patches_ref[t * C:(t + 1) * C, :] = tap
            t += 1

    # 3x3 ConvLBP as ONE deep-contraction MXU matmul over (tap, channel).
    conv = jnp.dot(wcat_ref[...], patches_ref[...],
                   preferred_element_type=jnp.float32)      # (K, HW)
    act = jnp.maximum(conv, 0.0)                            # ReLU
    y = jnp.dot(w1_ref[...], act,
                preferred_element_type=jnp.float32)         # (C, HW) 1x1 conv
    o_ref[0] = (y + b1_ref[...] + x).astype(o_ref.dtype)    # bias + residual add


@jax.jit
def block_lbp(x_nchw, w_lbp, w1, b1, gamma, beta):
    """BlockLBP forward.

    x_nchw: (N, C, H, W) f32
    w_lbp:  (K, C, 3, 3) ternary ConvLBP weights (PyTorch OIHW layout, no bias)
    w1:     (C, K) 1x1 conv weights,  b1: (C,) bias
    gamma, beta: (C,) BatchNorm affine parameters
    """
    x = x_nchw.astype(jnp.float32)
    N, C, H, W = x.shape
    K = w_lbp.shape[0]
    HW = H * W

    # BatchNorm2d (training-mode batch statistics, biased variance), hoisted out
    # of the kernel and folded into a single per-channel affine (scale, shift).
    mean = jnp.mean(x, axis=(0, 2, 3))
    var = jnp.var(x, axis=(0, 2, 3))
    scale = gamma.astype(jnp.float32) * lax.rsqrt(var + EPS)      # (C,)
    shift = beta.astype(jnp.float32) - mean * scale               # (C,)

    # im2col weight layout: wcat[k, t*C + c] = w_lbp[k, c, dy, dx], t = dy*3+dx.
    wcat = jnp.transpose(w_lbp.astype(jnp.float32), (0, 2, 3, 1)).reshape(K, 9 * C)

    # Free (contiguous) reshape only -- no transposes, no channel padding in HBM.
    x_flat = x.reshape(N, C, HW)

    kernel = functools.partial(_block_lbp_kernel, H=H, W=W)
    # TODO(synk): for very large H*W add an H row-block grid axis with 1-row halos.
    out_flat = pl.pallas_call(
        kernel,
        out_shape=jax.ShapeDtypeStruct((N, C, HW), jnp.float32),
        grid=(N,),
        in_specs=[
            pl.BlockSpec((1, C, HW), lambda n: (n, 0, 0)),   # x, one image per step
            pl.BlockSpec((K, 9 * C), lambda n: (0, 0)),      # wcat (im2col weights)
            pl.BlockSpec((C, K), lambda n: (0, 0)),          # 1x1 conv weights
            pl.BlockSpec((C, 1), lambda n: (0, 0)),          # 1x1 conv bias
            pl.BlockSpec((C, 1), lambda n: (0, 0)),          # BN scale
            pl.BlockSpec((C, 1), lambda n: (0, 0)),          # BN shift
        ],
        out_specs=pl.BlockSpec((1, C, HW), lambda n: (n, 0, 0)),
        scratch_shapes=[pltpu.VMEM((9 * C, HW), jnp.float32)],
        compiler_params=pltpu.CompilerParams(
            dimension_semantics=("parallel",),
            vmem_limit_bytes=32 * 1024 * 1024),
    )(x_flat, wcat, w1.astype(jnp.float32),
      b1.astype(jnp.float32).reshape(C, 1),
      scale.reshape(C, 1), shift.reshape(C, 1))

    return out_flat.reshape(N, C, H, W)


def block_lbp_reference(x, w_lbp, w1, b1, gamma, beta):
    """Pure-JAX reference mirroring the PyTorch forward (NCHW)."""
    mean = jnp.mean(x, axis=(0, 2, 3), keepdims=True)
    var = jnp.mean((x - mean) ** 2, axis=(0, 2, 3), keepdims=True)
    xn = ((x - mean) * lax.rsqrt(var + EPS) * gamma[None, :, None, None]
          + beta[None, :, None, None])
    conv = lax.conv_general_dilated(
        xn, w_lbp, (1, 1), 'SAME',
        dimension_numbers=('NCHW', 'OIHW', 'NCHW'),
        precision=lax.Precision.HIGHEST)
    act = jnp.maximum(conv, 0.0)
    y = jnp.einsum('nkhw,ck->nchw', act, w1,
                   precision=lax.Precision.HIGHEST) + b1[None, :, None, None]
    return y + x


if __name__ == "__main__":
    # numChannels=4, numWeights=8, sparsity=0.5, input (2, 4, 16, 16)
    N, C, H, W, K = 2, 4, 16, 16, 8
    sparsity = 0.5

    key = jax.random.PRNGKey(0)
    kx, kb, km, kw, kbias = jax.random.split(key, 5)

    x = jax.random.normal(kx, (N, C, H, W), jnp.float32)

    # ConvLBP weights: bernoulli(0.5)*2-1 with sparsity mask -> {-1, 0, +1},
    # PyTorch OIHW layout (K, C, 3, 3); frozen (no grad) -> plain constants.
    bern = jnp.where(jax.random.uniform(kb, (K, C, 3, 3)) < 0.5, 1.0, -1.0)
    mask_inactive = jax.random.uniform(km, (K, C, 3, 3)) > sparsity
    w_lbp = jnp.where(mask_inactive, 0.0, bern).astype(jnp.float32)

    # 1x1 conv: weight (C, K) so out[c] = sum_k w1[c, k] * act[k]; bias (C,).
    bound = float(K) ** -0.5
    w1 = jax.random.uniform(kw, (C, K), jnp.float32, -bound, bound)
    b1 = jax.random.uniform(kbias, (C,), jnp.float32, -bound, bound)

    # BatchNorm2d default affine params.
    gamma = jnp.ones((C,), jnp.float32)
    beta = jnp.zeros((C,), jnp.float32)

    out = jax.block_until_ready(block_lbp(x, w_lbp, w1, b1, gamma, beta))

    ref = block_lbp_reference(x, w_lbp, w1, b1, gamma, beta)
    assert out.shape == (N, C, H, W), out.shape
    if not jnp.allclose(out, ref, atol=1e-3, rtol=1e-3):
        raise AssertionError(
            f"mismatch, max abs err = {float(jnp.max(jnp.abs(out - ref)))}")
    print("KERNEL_OK")
</pallas_src>

<mosaic_0001>
module attributes {stable_mosaic.version = 11 : i64} {
  func.func @_block_lbp_kernel(%arg0: i32, %arg1: memref<1x4x256xf32, #tpu.memory_space<vmem>>, %arg2: memref<8x36xf32, #tpu.memory_space<vmem>>, %arg3: memref<4x8xf32, #tpu.memory_space<vmem>>, %arg4: memref<4x1xf32, #tpu.memory_space<vmem>>, %arg5: memref<4x1xf32, #tpu.memory_space<vmem>>, %arg6: memref<4x1xf32, #tpu.memory_space<vmem>>, %arg7: memref<1x4x256xf32, #tpu.memory_space<vmem>>, %arg8: memref<36x256xf32, #tpu.memory_space<vmem>>) attributes {dimension_semantics = [#tpu.dimension_semantics<parallel>], iteration_bounds = array<i64: 2>, scalar_prefetch = 0 : i64, scratch_operands = 1 : i64, tpu.core_type = #tpu.core_type<tc>, window_params = [{transform_indices = @transform_0, window_bounds = array<i64: 1, 4, 256>}, {pipeline_mode = #tpu.pipeline_mode<synchronous>, transform_indices = @transform_1, window_bounds = array<i64: 8, 36>}, {pipeline_mode = #tpu.pipeline_mode<synchronous>, transform_indices = @transform_2, window_bounds = array<i64: 4, 8>}, {pipeline_mode = #tpu.pipeline_mode<synchronous>, transform_indices = @transform_3, window_bounds = array<i64: 4, 1>}, {pipeline_mode = #tpu.pipeline_mode<synchronous>, transform_indices = @transform_4, window_bounds = array<i64: 4, 1>}, {pipeline_mode = #tpu.pipeline_mode<synchronous>, transform_indices = @transform_5, window_bounds = array<i64: 4, 1>}, {transform_indices = @transform_6, window_bounds = array<i64: 1, 4, 256>}]} {
    %c0 = arith.constant 0 : index
    %c0_0 = arith.constant 0 : index
    %c0_1 = arith.constant 0 : index
    %0 = vector.load %arg1[%c0, %c0_0, %c0_1] : memref<1x4x256xf32, #tpu.memory_space<vmem>>, vector<1x4x256xf32>
    %1 = vector.shape_cast %0 : vector<1x4x256xf32> to vector<4x256xf32>
    %c0_2 = arith.constant 0 : index
    %c0_3 = arith.constant 0 : index
    %2 = vector.load %arg5[%c0_2, %c0_3] : memref<4x1xf32, #tpu.memory_space<vmem>>, vector<4x1xf32>
    %3 = vector.broadcast %2 : vector<4x1xf32> to vector<4x256xf32>
    %4 = arith.mulf %1, %3 : vector<4x256xf32>
    %c0_4 = arith.constant 0 : index
    %c0_5 = arith.constant 0 : index
    %5 = vector.load %arg6[%c0_4, %c0_5] : memref<4x1xf32, #tpu.memory_space<vmem>>, vector<4x1xf32>
    %6 = vector.broadcast %5 : vector<4x1xf32> to vector<4x256xf32>
    %7 = arith.addf %4, %6 : vector<4x256xf32>
    %8 = tpu.iota {dimensions = array<i32: 1>} : vector<1x256xi32>
    %c15_i32 = arith.constant 15 : i32
    %9 = vector.broadcast %c15_i32 : i32 to vector<1x256xi32>
    %10 = arith.andi %8, %9 : vector<1x256xi32>
    %c17_i32 = arith.constant 17 : i32
    %11 = tpu.dynamic_rotate %7 by %c17_i32 dim 1 : vector<4x256xf32>, i32 -> vector<4x256xf32>
    %c16_i32 = arith.constant 16 : i32
    %12 = vector.broadcast %c16_i32 : i32 to vector<1x256xi32>
    %13 = arith.cmpi sge, %8, %12 : vector<1x256xi32>
    %c272_i32 = arith.constant 272 : i32
    %14 = vector.broadcast %c272_i32 : i32 to vector<1x256xi32>
    %15 = arith.cmpi slt, %8, %14 : vector<1x256xi32>
    %16 = arith.andi %13, %15 : vector<1x256xi1>
    %c1_i32 = arith.constant 1 : i32
    %17 = vector.broadcast %c1_i32 : i32 to vector<1x256xi32>
    %18 = arith.cmpi sge, %10, %17 : vector<1x256xi32>
    %19 = arith.andi %16, %18 : vector<1x256xi1>
    %c17_i32_6 = arith.constant 17 : i32
    %20 = vector.broadcast %c17_i32_6 : i32 to vector<1x256xi32>
    %21 = arith.cmpi slt, %10, %20 : vector<1x256xi32>
    %22 = arith.andi %19, %21 : vector<1x256xi1>
    %cst = arith.constant 0.000000e+00 : f32
    %23 = vector.shape_cast %22 : vector<1x256xi1> to vector<1x256xi1>
    %24 = vector.broadcast %23 : vector<1x256xi1> to vector<4x256xi1>
    %25 = vector.broadcast %cst : f32 to vector<4x256xf32>
    %26 = arith.select %24, %11, %25 : vector<4x256xi1>, vector<4x256xf32>
    %c0_7 = arith.constant 0 : index
    %c0_8 = arith.constant 0 : index
    %27 = vector.load %arg8[%c0_7, %c0_8] : memref<36x256xf32, #tpu.memory_space<vmem>>, vector<4x256xf32>
    tpu.vector_store %arg8[%c0_7, %c0_8], %26 {strides = array<i32>} : memref<36x256xf32, #tpu.memory_space<vmem>>, vector<4x256xf32>,
    %c16_i32_9 = arith.constant 16 : i32
    %28 = tpu.dynamic_rotate %7 by %c16_i32_9 dim 1 : vector<4x256xf32>, i32 -> vector<4x256xf32>
    %c16_i32_10 = arith.constant 16 : i32
    %29 = vector.broadcast %c16_i32_10 : i32 to vector<1x256xi32>
    %30 = arith.cmpi sge, %8, %29 : vector<1x256xi32>
    %c272_i32_11 = arith.constant 272 : i32
    %31 = vector.broadcast %c272_i32_11 : i32 to vector<1x256xi32>
    %32 = arith.cmpi slt, %8, %31 : vector<1x256xi32>
    %33 = arith.andi %30, %32 : vector<1x256xi1>
    %c0_i32 = arith.constant 0 : i32
    %34 = vector.broadcast %c0_i32 : i32 to vector<1x256xi32>
    %35 = arith.cmpi sge, %10, %34 : vector<1x256xi32>
    %36 = arith.andi %33, %35 : vector<1x256xi1>
    %c16_i32_12 = arith.constant 16 : i32
    %37 = vector.broadcast %c16_i32_12 : i32 to vector<1x256xi32>
    %38 = arith.cmpi slt, %10, %37 : vector<1x256xi32>
    %39 = arith.andi %36, %38 : vector<1x256xi1>
    %cst_13 = arith.constant 0.000000e+00 : f32
    %40 = vector.shape_cast %39 : vector<1x256xi1> to vector<1x256xi1>
    %41 = vector.broadcast %40 : vector<1x256xi1> to vector<4x256xi1>
    %42 = vector.broadcast %cst_13 : f32 to vector<4x256xf32>
    %43 = arith.select %41, %28, %42 : vector<4x256xi1>, vector<4x256xf32>
    %c4 = arith.constant 4 : index
    %c0_14 = arith.constant 0 : index
    %44 = vector.load %arg8[%c4, %c0_14] : memref<36x256xf32, #tpu.memory_space<vmem>>, vector<4x256xf32>
    tpu.vector_store %arg8[%c4, %c0_14], %43 {strides = array<i32>} : memref<36x256xf32, #tpu.memory_space<vmem>>, vector<4x256xf32>,
    %c15_i32_15 = arith.constant 15 : i32
    %45 = tpu.dynamic_rotate %7 by %c15_i32_15 dim 1 : vector<4x256xf32>, i32 -> vector<4x256xf32>
    %c16_i32_16 = arith.constant 16 : i32
    %46 = vector.broadcast %c16_i32_16 : i32 to vector<1x256xi32>
    %47 = arith.cmpi sge, %8, %46 : vector<1x256xi32>
    %c272_i32_17 = arith.constant 272 : i32
    %48 = vector.broadcast %c272_i32_17 : i32 to vector<1x256xi32>
    %49 = arith.cmpi slt, %8, %48 : vector<1x256xi32>
    %50 = arith.andi %47, %49 : vector<1x256xi1>
    %c-1_i32 = arith.constant -1 : i32
    %51 = vector.broadcast %c-1_i32 : i32 to vector<1x256xi32>
    %52 = arith.cmpi sge, %10, %51 : vector<1x256xi32>
    %53 = arith.andi %50, %52 : vector<1x256xi1>
    %c15_i32_18 = arith.constant 15 : i32
    %54 = vector.broadcast %c15_i32_18 : i32 to vector<1x256xi32>
    %55 = arith.cmpi slt, %10, %54 : vector<1x256xi32>
    %56 = arith.andi %53, %55 : vector<1x256xi1>
    %cst_19 = arith.constant 0.000000e+00 : f32
    %57 = vector.shape_cast %56 : vector<1x256xi1> to vector<1x256xi1>
    %58 = vector.broadcast %57 : vector<1x256xi1> to vector<4x256xi1>
    %59 = vector.broadcast %cst_19 : f32 to vector<4x256xf32>
    %60 = arith.select %58, %45, %59 : vector<4x256xi1>, vector<4x256xf32>
    %c8 = arith.constant 8 : index
    %c0_20 = arith.constant 0 : index
    %61 = vector.load %arg8[%c8, %c0_20] : memref<36x256xf32, #tpu.memory_space<vmem>>, vector<4x256xf32>
    tpu.vector_store %arg8[%c8, %c0_20], %60 {strides = array<i32>} : memref<36x256xf32, #tpu.memory_space<vmem>>, vector<4x256xf32>,
    %c1_i32_21 = arith.constant 1 : i32
    %62 = tpu.dynamic_rotate %7 by %c1_i32_21 dim 1 : vector<4x256xf32>, i32 -> vector<4x256xf32>
    %c0_i32_22 = arith.constant 0 : i32
    %63 = vector.broadcast %c0_i32_22 : i32 to vector<1x256xi32>
    %64 = arith.cmpi sge, %8, %63 : vector<1x256xi32>
    %c256_i32 = arith.constant 256 : i32
    %65 = vector.broadcast %c256_i32 : i32 to vector<1x256xi32>
    %66 = arith.cmpi slt, %8, %65 : vector<1x256xi32>
    %67 = arith.andi %64, %66 : vector<1x256xi1>
    %c1_i32_23 = arith.constant 1 : i32
    %68 = vector.broadcast %c1_i32_23 : i32 to vector<1x256xi32>
    %69 = arith.cmpi sge, %10, %68 : vector<1x256xi32>
    %70 = arith.andi %67, %69 : vector<1x256xi1>
    %c17_i32_24 = arith.constant 17 : i32
    %71 = vector.broadcast %c17_i32_24 : i32 to vector<1x256xi32>
    %72 = arith.cmpi slt, %10, %71 : vector<1x256xi32>
    %73 = arith.andi %70, %72 : vector<1x256xi1>
    %cst_25 = arith.constant 0.000000e+00 : f32
    %74 = vector.shape_cast %73 : vector<1x256xi1> to vector<1x256xi1>
    %75 = vector.broadcast %74 : vector<1x256xi1> to vector<4x256xi1>
    %76 = vector.broadcast %cst_25 : f32 to vector<4x256xf32>
    %77 = arith.select %75, %62, %76 : vector<4x256xi1>, vector<4x256xf32>
    %c12 = arith.constant 12 : index
    %c0_26 = arith.constant 0 : index
    %78 = vector.load %arg8[%c12, %c0_26] : memref<36x256xf32, #tpu.memory_space<vmem>>, vector<4x256xf32>
    tpu.vector_store %arg8[%c12, %c0_26], %77 {strides = array<i32>} : memref<36x256xf32, #tpu.memory_space<vmem>>, vector<4x256xf32>,
    %c16 = arith.constant 16 : index
    %c0_27 = arith.constant 0 : index
    %79 = vector.load %arg8[%c16, %c0_27] : memref<36x256xf32, #tpu.memory_space<vmem>>, vector<4x256xf32>
    tpu.vector_store %arg8[%c16, %c0_27], %7 {strides = array<i32>} : memref<36x256xf32, #tpu.memory_space<vmem>>, vector<4x256xf32>,
    %c255_i32 = arith.constant 255 : i32
    %80 = tpu.dynamic_rotate %7 by %c255_i32 dim 1 : vector<4x256xf32>, i32 -> vector<4x256xf32>
    %c0_i32_28 = arith.constant 0 : i32
    %81 = vector.broadcast %c0_i32_28 : i32 to vector<1x256xi32>
    %82 = arith.cmpi sge, %8, %81 : vector<1x256xi32>
    %c256_i32_29 = arith.constant 256 : i32
    %83 = vector.broadcast %c256_i32_29 : i32 to vector<1x256xi32>
    %84 = arith.cmpi slt, %8, %83 : vector<1x256xi32>
    %85 = arith.andi %82, %84 : vector<1x256xi1>
    %c-1_i32_30 = arith.constant -1 : i32
    %86 = vector.broadcast %c-1_i32_30 : i32 to vector<1x256xi32>
    %87 = arith.cmpi sge, %10, %86 : vector<1x256xi32>
    %88 = arith.andi %85, %87 : vector<1x256xi1>
    %c15_i32_31 = arith.constant 15 : i32
    %89 = vector.broadcast %c15_i32_31 : i32 to vector<1x256xi32>
    %90 = arith.cmpi slt, %10, %89 : vector<1x256xi32>
    %91 = arith.andi %88, %90 : vector<1x256xi1>
    %cst_32 = arith.constant 0.000000e+00 : f32
    %92 = vector.shape_cast %91 : vector<1x256xi1> to vector<1x256xi1>
    %93 = vector.broadcast %92 : vector<1x256xi1> to vector<4x256xi1>
    %94 = vector.broadcast %cst_32 : f32 to vector<4x256xf32>
    %95 = arith.select %93, %80, %94 : vector<4x256xi1>, vector<4x256xf32>
    %c20 = arith.constant 20 : index
    %c0_33 = arith.constant 0 : index
    %96 = vector.load %arg8[%c20, %c0_33] : memref<36x256xf32, #tpu.memory_space<vmem>>, vector<4x256xf32>
    tpu.vector_store %arg8[%c20, %c0_33], %95 {strides = array<i32>} : memref<36x256xf32, #tpu.memory_space<vmem>>, vector<4x256xf32>,
    %c241_i32 = arith.constant 241 : i32
    %97 = tpu.dynamic_rotate %7 by %c241_i32 dim 1 : vector<4x256xf32>, i32 -> vector<4x256xf32>
    %c-16_i32 = arith.constant -16 : i32
    %98 = vector.broadcast %c-16_i32 : i32 to vector<1x256xi32>
    %99 = arith.cmpi sge, %8, %98 : vector<1x256xi32>
    %c240_i32 = arith.constant 240 : i32
    %100 = vector.broadcast %c240_i32 : i32 to vector<1x256xi32>
    %101 = arith.cmpi slt, %8, %100 : vector<1x256xi32>
    %102 = arith.andi %99, %101 : vector<1x256xi1>
    %c1_i32_34 = arith.constant 1 : i32
    %103 = vector.broadcast %c1_i32_34 : i32 to vector<1x256xi32>
    %104 = arith.cmpi sge, %10, %103 : vector<1x256xi32>
    %105 = arith.andi %102, %104 : vector<1x256xi1>
    %c17_i32_35 = arith.constant 17 : i32
    %106 = vector.broadcast %c17_i32_35 : i32 to vector<1x256xi32>
    %107 = arith.cmpi slt, %10, %106 : vector<1x256xi32>
    %108 = arith.andi %105, %107 : vector<1x256xi1>
    %cst_36 = arith.constant 0.000000e+00 : f32
    %109 = vector.shape_cast %108 : vector<1x256xi1> to vector<1x256xi1>
    %110 = vector.broadcast %109 : vector<1x256xi1> to vector<4x256xi1>
    %111 = vector.broadcast %cst_36 : f32 to vector<4x256xf32>
    %112 = arith.select %110, %97, %111 : vector<4x256xi1>, vector<4x256xf32>
    %c24 = arith.constant 24 : index
    %c0_37 = arith.constant 0 : index
    %113 = vector.load %arg8[%c24, %c0_37] : memref<36x256xf32, #tpu.memory_space<vmem>>, vector<4x256xf32>
    tpu.vector_store %arg8[%c24, %c0_37], %112 {strides = array<i32>} : memref<36x256xf32, #tpu.memory_space<vmem>>, vector<4x256xf32>,
    %c240_i32_38 = arith.constant 240 : i32
    %114 = tpu.dynamic_rotate %7 by %c240_i32_38 dim 1 : vector<4x256xf32>, i32 -> vector<4x256xf32>
    %c-16_i32_39 = arith.constant -16 : i32
    %115 = vector.broadcast %c-16_i32_39 : i32 to vector<1x256xi32>
    %116 = arith.cmpi sge, %8, %115 : vector<1x256xi32>
    %c240_i32_40 = arith.constant 240 : i32
    %117 = vector.broadcast %c240_i32_40 : i32 to vector<1x256xi32>
    %118 = arith.cmpi slt, %8, %117 : vector<1x256xi32>
    %119 = arith.andi %116, %118 : vector<1x256xi1>
    %c0_i32_41 = arith.constant 0 : i32
    %120 = vector.broadcast %c0_i32_41 : i32 to vector<1x256xi32>
    %121 = arith.cmpi sge, %10, %120 : vector<1x256xi32>
    %122 = arith.andi %119, %121 : vector<1x256xi1>
    %c16_i32_42 = arith.constant 16 : i32
    %123 = vector.broadcast %c16_i32_42 : i32 to vector<1x256xi32>
    %124 = arith.cmpi slt, %10, %123 : vector<1x256xi32>
    %125 = arith.andi %122, %124 : vector<1x256xi1>
    %cst_43 = arith.constant 0.000000e+00 : f32
    %126 = vector.shape_cast %125 : vector<1x256xi1> to vector<1x256xi1>
    %127 = vector.broadcast %126 : vector<1x256xi1> to vector<4x256xi1>
    %128 = vector.broadcast %cst_43 : f32 to vector<4x256xf32>
    %129 = arith.select %127, %114, %128 : vector<4x256xi1>, vector<4x256xf32>
    %c28 = arith.constant 28 : index
    %c0_44 = arith.constant 0 : index
    %130 = vector.load %arg8[%c28, %c0_44] : memref<36x256xf32, #tpu.memory_space<vmem>>, vector<4x256xf32>
    tpu.vector_store %arg8[%c28, %c0_44], %129 {strides = array<i32>} : memref<36x256xf32, #tpu.memory_space<vmem>>, vector<4x256xf32>,
    %c239_i32 = arith.constant 239 : i32
    %131 = tpu.dynamic_rotate %7 by %c239_i32 dim 1 : vector<4x256xf32>, i32 -> vector<4x256xf32>
    %c-16_i32_45 = arith.constant -16 : i32
    %132 = vector.broadcast %c-16_i32_45 : i32 to vector<1x256xi32>
    %133 = arith.cmpi sge, %8, %132 : vector<1x256xi32>
    %c240_i32_46 = arith.constant 240 : i32
    %134 = vector.broadcast %c240_i32_46 : i32 to vector<1x256xi32>
    %135 = arith.cmpi slt, %8, %134 : vector<1x256xi32>
    %136 = arith.andi %133, %135 : vector<1x256xi1>
    %c-1_i32_47 = arith.constant -1 : i32
    %137 = vector.broadcast %c-1_i32_47 : i32 to vector<1x256xi32>
    %138 = arith.cmpi sge, %10, %137 : vector<1x256xi32>
    %139 = arith.andi %136, %138 : vector<1x256xi1>
    %c15_i32_48 = arith.constant 15 : i32
    %140 = vector.broadcast %c15_i32_48 : i32 to vector<1x256xi32>
    %141 = arith.cmpi slt, %10, %140 : vector<1x256xi32>
    %142 = arith.andi %139, %141 : vector<1x256xi1>
    %cst_49 = arith.constant 0.000000e+00 : f32
    %143 = vector.shape_cast %142 : vector<1x256xi1> to vector<1x256xi1>
    %144 = vector.broadcast %143 : vector<1x256xi1> to vector<4x256xi1>
    %145 = vector.broadcast %cst_49 : f32 to vector<4x256xf32>
    %146 = arith.select %144, %131, %145 : vector<4x256xi1>, vector<4x256xf32>
    %c32 = arith.constant 32 : index
    %c0_50 = arith.constant 0 : index
    %147 = vector.load %arg8[%c32, %c0_50] : memref<36x256xf32, #tpu.memory_space<vmem>>, vector<4x256xf32>
    tpu.vector_store %arg8[%c32, %c0_50], %146 {strides = array<i32>} : memref<36x256xf32, #tpu.memory_space<vmem>>, vector<4x256xf32>,
    %c0_51 = arith.constant 0 : index
    %c0_52 = arith.constant 0 : index
    %148 = vector.load %arg2[%c0_51, %c0_52] : memref<8x36xf32, #tpu.memory_space<vmem>>, vector<8x36xf32>
    %c0_53 = arith.constant 0 : index
    %c0_54 = arith.constant 0 : index
    %149 = vector.load %arg8[%c0_53, %c0_54] : memref<36x256xf32, #tpu.memory_space<vmem>>, vector<36x256xf32>
    %cst_55 = arith.constant dense<0.000000e+00> : vector<8x256xf32>
    %150 = tpu.matmul %148, %149, %cst_55 {dimension_numbers = #tpu.dot_dimension_numbers<[1], [0], [0], [1], [0, 0, 1, 1], [], []>} : vector<8x36xf32>, vector<36x256xf32>, vector<8x256xf32> -> vector<8x256xf32>
    %cst_56 = arith.constant 0.000000e+00 : f32
    %151 = vector.broadcast %cst_56 : f32 to vector<8x256xf32>
    %152 = arith.maximumf %150, %151 : vector<8x256xf32>
    %c0_57 = arith.constant 0 : index
    %c0_58 = arith.constant 0 : index
    %153 = vector.load %arg3[%c0_57, %c0_58] : memref<4x8xf32, #tpu.memory_space<vmem>>, vector<4x8xf32>
    %cst_59 = arith.constant dense<0.000000e+00> : vector<4x256xf32>
    %154 = tpu.matmul %153, %152, %cst_59 {dimension_numbers = #tpu.dot_dimension_numbers<[1], [0], [0], [1], [0, 0, 1, 1], [], []>} : vector<4x8xf32>, vector<8x256xf32>, vector<4x256xf32> -> vector<4x256xf32>
    %c0_60 = arith.constant 0 : index
    %c0_61 = arith.constant 0 : index
    %155 = vector.load %arg4[%c0_60, %c0_61] : memref<4x1xf32, #tpu.memory_space<vmem>>, vector<4x1xf32>
    %156 = vector.broadcast %155 : vector<4x1xf32> to vector<4x256xf32>
    %157 = arith.addf %154, %156 : vector<4x256xf32>
    %158 = arith.addf %157, %1 : vector<4x256xf32>
    %c0_62 = arith.constant 0 : index
    %c0_63 = arith.constant 0 : index
    %c0_64 = arith.constant 0 : index
    %159 = vector.load %arg7[%c0_62, %c0_63, %c0_64] : memref<1x4x256xf32, #tpu.memory_space<vmem>>, vector<1x4x256xf32>
    %160 = vector.shape_cast %159 : vector<1x4x256xf32> to vector<4x256xf32>
    %161 = vector.shape_cast %158 : vector<4x256xf32> to vector<1x4x256xf32>
    tpu.vector_store %arg7[%c0_62, %c0_63, %c0_64], %161 {strides = array<i32>} : memref<1x4x256xf32, #tpu.memory_space<vmem>>, vector<1x4x256xf32>,
    return
  }
  func.func @transform_0(%arg0: i32) -> (i32, i32, i32) {
    %c0_i32 = arith.constant 0 : i32
    %c0_i32_0 = arith.constant 0 : i32
    %c0_i32_1 = arith.constant 0 : i32
    return %arg0, %c0_i32, %c0_i32_0 : i32, i32, i32
  }
  func.func @transform_1(%arg0: i32) -> (i32, i32) {
    %c0_i32 = arith.constant 0 : i32
    %c0_i32_0 = arith.constant 0 : i32
    %c0_i32_1 = arith.constant 0 : i32
    return %c0_i32, %c0_i32_0 : i32, i32
  }
  func.func @transform_2(%arg0: i32) -> (i32, i32) {
    %c0_i32 = arith.constant 0 : i32
    %c0_i32_0 = arith.constant 0 : i32
    %c0_i32_1 = arith.constant 0 : i32
    return %c0_i32, %c0_i32_0 : i32, i32
  }
  func.func @transform_3(%arg0: i32) -> (i32, i32) {
    %c0_i32 = arith.constant 0 : i32
    %c0_i32_0 = arith.constant 0 : i32
    %c0_i32_1 = arith.constant 0 : i32
    return %c0_i32, %c0_i32_0 : i32, i32
  }
  func.func @transform_4(%arg0: i32) -> (i32, i32) {
    %c0_i32 = arith.constant 0 : i32
    %c0_i32_0 = arith.constant 0 : i32
    %c0_i32_1 = arith.constant 0 : i32
    return %c0_i32, %c0_i32_0 : i32, i32
  }
  func.func @transform_5(%arg0: i32) -> (i32, i32) {
    %c0_i32 = arith.constant 0 : i32
    %c0_i32_0 = arith.constant 0 : i32
    %c0_i32_1 = arith.constant 0 : i32
    return %c0_i32, %c0_i32_0 : i32, i32
  }
  func.func @transform_6(%arg0: i32) -> (i32, i32, i32) {
    %c0_i32 = arith.constant 0 : i32
    %c0_i32_0 = arith.constant 0 : i32
    %c0_i32_1 = arith.constant 0 : i32
    return %arg0, %c0_i32, %c0_i32_0 : i32, i32, i32
  }
}

</mosaic_0001>

<bundles_post_ra>
// kernel: block_lbp.1
= control target key start
LH: loop header
LB: loop body
LE: loop exit
PB: predicated region body
PF: predicated region fallthrough
CT: control target
= control target key end

     0   :  { %s839_s21 = smov 0   ;;  %s953_s0 = inlined_call_operand.vmem [shape: f32[2,4,256], index: 0, kind: input, shape index: {}]   ;;  %s954_s1 = inlined_call_operand.vmem [shape: f32[8,36], index: 1, kind: input, shape index: {}]   ;;  %s955_s2 = inlined_call_operand.vmem [shape: f32[4,8], index: 2, kind: input, shape index: {}]   ;;  %s956_s3 = inlined_call_operand.vmem [shape: f32[4,1], index: 3, kind: input, shape index: {}]   ;;  %s957_s4 = inlined_call_operand.vmem [shape: f32[4,1], index: 4, kind: input, shape index: {}]   ;;  %s958_s5 = inlined_call_operand.vmem [shape: f32[4,1], index: 5, kind: input, shape index: {}]   ;;  %s959_s6 = inlined_call_operand.vmem [shape: f32[2,4,256], index: 6, kind: output, shape index: {}]  }
   0x1 LB: > { %s739_s22 = sadd.s32 4294967295, %s791_s21   ;;  %p743_p0 = scmp.ge.s32.totalorder %s791_s21, 1  ;;  %s791_s21 = sphi %s839_s21, %s16_s21  }
   0x2   : > { %p212_p1 = scmp.lt.s32.totalorder %s791_s21, 3 }
   0x4   : > { %p213_p2 = pnand %p743_p0, %p212_p1 }
   0x5   : > { %v253_v0 = vld [vmem:[%s957_s4] sm:$0xf] (!%p213_p2)  ;;  %v793_v1 = vmov (!%p213_p2), 0   ;;  %p242_p3 = scmp.lt.s32.totalorder (!%p213_p2), %s739_s22, 1  ;;  %v794_v3 = vmov (!%p213_p2), 839922192   ;;  %v261_v5 = vlaneseq (!%p213_p2) }
   0x6   : > { %216 = sbr.rel (%p213_p2) target bundleno = 741 (0x2e5), region = 44  ;;  %783 = vset.pattern.permute.xlu0 (!%p213_p2), %v793_v1  ;;  %v267_v2 = vld [vmem:[%s958_s5] sm:$0xf] (!%p213_p2)  ;;  %v259_v4 = vunpack.c.l.s4 (!%p213_p2), %v794_v3  ;;  %s795_s7 = smov (!%p213_p2), 16   ;;  %v803_v18 = vmov (!%p213_p2), 0.0  }
   0x7   : > { %256 = vperm.xlu0 (!%p213_p2), %783, %v253_v0   ;;  %v262_v7 = vshrl.u32 (!%p213_p2), %v261_v5, 7  ;;  %s796_s8 = smov (!%p213_p2), 1   ;;  %s797_s9 = smov (!%p213_p2), 17   ;;  %v593_v17 = vld [vmem:[%s956_s3] sm:$0xf] (!%p213_p2)  ;;  %583 = vmatprep.mubr.f32.mxu0 (!%p213_p2), %v803_v18  ;;  %v867_v19 = vand.u32 (!%p213_p2), 127, %v261_v5 }
   0x8   : > { %v260_v6 = vunpack.c.0.s8 (!%p213_p2), %v259_v4  ;;  %s798_s10 = smov (!%p213_p2), 15   ;;  %s799_s11 = smov (!%p213_p2), 127   ;;  %667 = vmatprep.mubr.f32.mxu1 (!%p213_p2), %v803_v18 }
   0x9   : > { %s800_s12 = smov (!%p213_p2), 112   ;;  %s801_s13 = smov (!%p213_p2), 113   ;;  %v870_v20 = vadd.s32 (!%p213_p2), 128, %v867_v19  ;;  %v284_v21 = vand.u32 (!%p213_p2), 15, %v867_v19  ;;  %vm374_vm0 = vcmp.lt.s32.totalorder (!%p213_p2), %v867_v19, 1  ;;  %vm322_vm3 = vcmp.lt.s32.totalorder (!%p213_p2), %v867_v19, 16 }
   0xa   : > { %v263_v8 = vsub.s32 (!%p213_p2), %v260_v6, %v262_v7  ;;  %s802_s14 = smov (!%p213_p2), 111   ;;  %vm296_vm4 = vcmp.ge.s32.totalorder (!%p213_p2), %v867_v19, 16  ;;  %vm293_vm5 = vcmp.lt.s32.totalorder (!%p213_p2), %v867_v19, 17  ;;  %vm351_vm8 = vcmp.lt.s32.totalorder (!%p213_p2), %v867_v19, 15 }
   0xb   : > { %270 = vperm.xlu0 (!%p213_p2), %783, %v267_v2   ;;  %v285_v22 = vand.u32 (!%p213_p2), 15, %v870_v20  ;;  %vm875_vm1 = vcmp.ge.s32.totalorder (!%p213_p2), %v284_v21, 1  ;;  %vm896_vm7 = vcmp.lt.s32.totalorder (!%p213_p2), %v284_v21, 15  ;;  %vm407_vm11 = vcmp.lt.s32.totalorder (!%p213_p2), %v867_v19, 127 }
   0xc   : > { %vm304_vm6 = vmand (!%p213_p2), %vm296_vm4, %vm875_vm1  ;;  %vm457_vm12 = vcmp.lt.s32.totalorder (!%p213_p2), %v867_v19, 112  ;;  %vm438_vm13 = vcmp.lt.s32.totalorder (!%p213_p2), %v870_v20, 240  ;;  %vm432_vm14 = vcmp.lt.s32.totalorder (!%p213_p2), %v867_v19, 113 }
   0xd   : > { %s969_s22 = smov (!%p242_p3, %s739_s22), 1  ;;  %vm879_vm2 = vcmp.ge.s32.totalorder %v285_v22, 1  ;;  %vm903_vm9 = vcmp.lt.s32.totalorder %v285_v22, 15  ;;  %vm360_vm10 = vmand %vm296_vm4, %vm896_vm7 }
   0xe   : > { %s754_s27 = sshll.u32 %s969_s22, 3  ;;  %vm442_vm15 = vmand %vm438_vm13, %vm879_vm2 }
   0xf   : > { %s246_s30 = scalar_lea.vmem %s953_s0, %s754_s27  ;;  %s251_s25 = scalar_lea.vmem %s959_s6, %s754_s27 }
  0x10   : > { %v861_v11 = vld [vmem:[%s246_s30] sm:$0xff] }
  0x86   : > { %v257_v9 = vpop.permute.xlu0 %256 }
  0x87   : > { %v264_v10 = vrot.slane %v257_v9, %v263_v8 }
  0x89   : > { %v266_v13 = vmul.f32 %v264_v10, %v861_v11 }
  0x8a   : > { %v271_v12 = vpop.permute.xlu0 %270 }
  0x8b   : > { %v278_v14 = vrot.slane %v271_v12, %v263_v8 }
  0x8d   : > { %v280_v15 = vadd.f32 %v278_v14, %v266_v13 }
  0x8f   : > { %401 = vst [vmem:[#allocation2 + $0x20] sm:$0xf] %v280_v15  ;;  %318 = vrot.lane.b32.xlu0 %v280_v15, %s795_s7  ;;  %370 = vrot.lane.b32.xlu1 %v280_v15, %s796_s8  ;;  %v287_v16 = vcombine.high %v280_v15, %v280_v15 }
  0x91   : > { %402 = vst [vmem:[#allocation2 + $0x28] sm:$0xf] %v287_v16 }
  0x93   : > { %289 = vrot.lane.b32.xlu0 %v280_v15, %s797_s9  ;;  %372 = vrot.lane.b32.xlu1 %v287_v16, %s796_s8 }
  0x97   : > { %347 = vrot.lane.b32.xlu0 %v280_v15, %s798_s10  ;;  %320 = vrot.lane.b32.xlu1 %v287_v16, %s795_s7 }
  0x9b   : > { %403 = vrot.lane.b32.xlu0 %v280_v15, %s799_s11  ;;  %291 = vrot.lane.b32.xlu1 %v287_v16, %s797_s9 }
  0x9f   : > { %453 = vrot.lane.b32.xlu0 %v280_v15, %s800_s12  ;;  %349 = vrot.lane.b32.xlu1 %v287_v16, %s798_s10 }
  0xa3   : > { %428 = vrot.lane.b32.xlu0 %v280_v15, %s801_s13  ;;  %405 = vrot.lane.b32.xlu1 %v287_v16, %s799_s11 }
  0xa7   : > { %478 = vrot.lane.b32.xlu0 %v280_v15, %s802_s14  ;;  %455 = vrot.lane.b32.xlu1 %v287_v16, %s800_s12 }
  0xab   : > { %596 = vperm.xlu0 %783, %v593_v17   ;;  %430 = vrot.lane.b32.xlu1 %v287_v16, %s801_s13 }
  0xaf   : > { %480 = vrot.lane.b32.xlu1 %v287_v16, %s802_s14 }
 0x101   : > { %v319_v23 = vpop.permute.xlu0 %318  ;;  %v371_v24 = vpop.permute.xlu1 %370 }
 0x105   : > { %v290_v27 = vpop.permute.xlu0 %289  ;;  %v373_v28 = vpop.permute.xlu1 %372 }
 0x106   : > { %v375_v29 = vsel %vm374_vm0, %v371_v24, %v373_v28  ;;  %v376_v30 = vsel %vm374_vm0, %v373_v28, %v371_v24  ;;  %vm482_vm0 = vcmp.lt.s32.totalorder %v867_v19, 111 }
 0x107   : > { %v391_v31 = vsel %vm875_vm1, %v376_v30, 0.0  ;;  %v392_v32 = vsel %vm879_vm2, %v375_v29, 0.0 }
 0x108   : > { %v395_v33 = vrot.slane %v391_v31, 4  ;;  %v396_v34 = vrot.slane %v392_v32, 4  ;;  %v497_v31 = vld [vmem:[%s954_s1] sm:$0xff] }
 0x109   : > { %v348_v35 = vpop.permute.xlu0 %347  ;;  %v321_v36 = vpop.permute.xlu1 %320 }
 0x10a   : > { %399 = vst [vmem:[#allocation2 + $0x10] sm:$0xf0] %v395_v33  ;;  %400 = vst [vmem:[#allocation2 + $0x18] sm:$0xf0] %v396_v34  ;;  %v323_v37 = vsel %vm322_vm3, %v319_v23, %v321_v36  ;;  %v324_v38 = vsel %vm322_vm3, %v321_v36, %v319_v23  ;;  %vm508_vm3 = vcmask 293888  }
 0x10b   : > { %v337_v39 = vsel %vm296_vm4, %v324_v38, 0.0  ;;  %v342_v40 = vrot.slane %v323_v37, 4  ;;  %v592_v37 = vld [vmem:[%s955_s2] sm:$0xf]  ;;  %vm599_vm4 = vcmask 64512  }
 0x10c   : > { %v341_v41 = vrot.slane %v337_v39, 4 }
 0x10d   : > { %346 = vst [vmem:[#allocation2 + $0x8] sm:$0xf0] %v342_v40  ;;  %v292_v42 = vpop.permute.xlu1 %291  ;;  %v404_v46 = vpop.permute.xlu0 %403  ;;  %v675_v40 = vcombine.high %v861_v11, %v861_v11 }
 0x10e   : > { %345 = vst [vmem:[#allocation2] sm:$0xf0] %v341_v41  ;;  %v294_v44 = vsel %vm293_vm5, %v290_v27, %v292_v42  ;;  %v295_v45 = vsel %vm293_vm5, %v292_v42, %v290_v27 }
 0x10f   : > { %v314_v47 = vsel %vm304_vm6, %v295_v45, 0.0  ;;  %v315_v48 = vsel %vm879_vm2, %v294_v44, 0.0  ;;  %vm488_vm2 = vmand %vm438_vm13, %vm903_vm9 }
 0x110   : > { %316 = vst [vmem:[#allocation2] sm:$0xf] %v314_v47  ;;  %317 = vst [vmem:[#allocation2 + $0x8] sm:$0xf] %v315_v48 }
 0x111   : > { %v350_v50 = vpop.permute.xlu1 %349  ;;  %v454_v55 = vpop.permute.xlu0 %453 }
 0x112   : > { %v352_v51 = vsel %vm351_vm8, %v348_v35, %v350_v50  ;;  %v353_v52 = vsel %vm351_vm8, %v350_v50, %v348_v35 }
 0x113   : > { %v366_v53 = vsel %vm360_vm10, %v353_v52, 0.0  ;;  %v367_v54 = vsel %vm903_vm9, %v352_v51, 0.0 }
 0x114   : > { %368 = vst [vmem:[#allocation2 + $0x10] sm:$0xf] %v366_v53  ;;  %369 = vst [vmem:[#allocation2 + $0x18] sm:$0xf] %v367_v54 }
 0x115   : > { %v406_v56 = vpop.permute.xlu1 %405  ;;  %v429_v3 = vpop.permute.xlu0 %428 }
 0x116   : > { %v408_v57 = vsel %vm407_vm11, %v404_v46, %v406_v56  ;;  %v409_v58 = vsel %vm407_vm11, %v406_v56, %v404_v46 }
 0x117   : > { %v418_v59 = vsel %vm896_vm7, %v408_v57, 0.0  ;;  %v419_v60 = vsel %vm903_vm9, %v409_v58, 0.0  ;;  %v499_v2 = vld [vmem:[#allocation2 + $0x8] sm:$0xff]  ;;  %v498_v7 = vld [vmem:[#allocation2] sm:$0xff] }
 0x118   : > { %v422_v61 = vrot.slane %v418_v59, 4  ;;  %v423_v62 = vrot.slane %v419_v60, 4 }
 0x119   : > { %v456_v63 = vpop.permute.xlu1 %455  ;;  %v479_v18 = vpop.permute.xlu0 %478 }
 0x11a   : > { %426 = vst [vmem:[#allocation2 + $0x20] sm:$0xf0] %v422_v61  ;;  %427 = vst [vmem:[#allocation2 + $0x28] sm:$0xf0] %v423_v62  ;;  %v458_v0 = vsel %vm457_vm12, %v454_v55, %v456_v63  ;;  %v459_v1 = vsel %vm457_vm12, %v456_v63, %v454_v55 }
 0x11b   : > { %v469_v4 = vsel %vm438_vm13, %v459_v1, 0.0  ;;  %v472_v5 = vrot.slane %v458_v0, 4  ;;  %v501_v6 = vld [vmem:[#allocation2 + $0x18] sm:$0xff]  ;;  %v500_v8 = vld [vmem:[#allocation2 + $0x10] sm:$0xff] }
 0x11c   : > { %v473_v9 = vrot.slane %v469_v4, 4  ;;  %v756_v10 = vpack.c.bf16 %v501_v6, %v499_v2  ;;  %v758_v12 = vpack.c.bf16 %v500_v8, %v498_v7 }
 0x11d   : > { %476 = vst [vmem:[#allocation2 + $0x30] sm:$0xf0] %v472_v5  ;;  %v431_v13 = vpop.permute.xlu1 %430 }
 0x11e   : > { %477 = vst [vmem:[#allocation2 + $0x38] sm:$0xf0] %v473_v9  ;;  %v433_v14 = vsel %vm432_vm14, %v429_v3, %v431_v13  ;;  %v434_v15 = vsel %vm432_vm14, %v431_v13, %v429_v3  ;;  %757 = vmatprep.subr.bf16.mxu0 %v756_v10 }
 0x11f   : > { %v449_v16 = vsel %vm875_vm1, %v433_v14, 0.0  ;;  %v450_v17 = vsel %vm442_vm15, %v434_v15, 0.0  ;;  %759 = vmatpush1.bf16.msra.mxu0 %v758_v12  ;;  %vm512_vm1 = vcmask 1043456  }
 0x120   : > { %451 = vst [vmem:[#allocation2 + $0x30] sm:$0xf] %v449_v16  ;;  %452 = vst [vmem:[#allocation2 + $0x38] sm:$0xf] %v450_v17 }
 0x121   : > { %v481_v21 = vpop.permute.xlu1 %480  ;;  %v503_v26 = vld [vmem:[#allocation2 + $0x28] sm:$0xff]  ;;  %v502_v19 = vld [vmem:[#allocation2 + $0x20] sm:$0xff] }
 0x122   : > { %v483_v22 = vsel %vm482_vm0, %v479_v18, %v481_v21  ;;  %v484_v23 = vsel %vm482_vm0, %v481_v21, %v479_v18 }
 0x123   : > { %v493_v24 = vsel %vm896_vm7, %v483_v22, 0.0  ;;  %v494_v25 = vsel %vm488_vm2, %v484_v23, 0.0 }
 0x124   : > { %495 = vst [vmem:[#allocation2 + $0x40] sm:$0xf] %v493_v24  ;;  %496 = vst [vmem:[#allocation2 + $0x48] sm:$0xf] %v494_v25 }
 0x127   : > { %v505_v27 = vld [vmem:[#allocation2 + $0x38] sm:$0xff]  ;;  %v504_v28 = vld [vmem:[#allocation2 + $0x30] sm:$0xff] }
 0x128   : > { %v760_v29 = vpack.c.bf16 %v505_v27, %v503_v26  ;;  %v762_v30 = vpack.c.bf16 %v504_v28, %v502_v19 }
 0x12a   : > { %761 = vmatprep.subr.bf16.mxu0 %v760_v29  ;;  %v597_v38 = vpop.permute.xlu0 %596 }
 0x12b   : > { %763 = vmatpush1.bf16.msra.mxu0 %v762_v30  ;;  %v507_v20 = vld [vmem:[#allocation2 + $0x48] sm:$0xf]  ;;  %v506_v32 = vld [vmem:[#allocation2 + $0x40] sm:$0xf] }
 0x12c   : > { %748 = vmatprep.subr.msk.mxu0 %vm512_vm1, %v507_v20 }
 0x12f   : > { %749 = vmatpush1.msk.msra.mxu0 %vm512_vm1, %v506_v32 }
 0x130   : > { %750 = vmatmul.mubr.msk.f32.vlgmr.msra.gmra.mrb[0].mxu0 %vm508_vm3, %v497_v31 }
 0x203   : > { %v585_v33 = vpop.f32.mrb[0].mxu0 }
 0x204   : > { %v587_v34 = vpop.f32.mrb[1].mxu0  ;;  %v590_v36 = vmax.f32 %v585_v33, 0.0 }
 0x205   : > { %v591_v35 = vmax.f32 %v587_v34, 0.0 }
 0x207   : > { %603 = vmatprep.subr.mxu1 %v591_v35 }
 0x208   : > { %604 = vmatpush1.msra.mxu1 %v590_v36 }
 0x209   : > { %751 = vmatmul.mubr.msk.f32.vlgmr.msra.gmra.mrb[0].mxu1 %vm599_vm4, %v592_v37 }
 0x2dc   : > { %v669_v39 = vpop.f32.mrb[0].mxu1 }
 0x2dd   : > { %v670_v41 = vadd.f32 %v669_v39, %v597_v38  ;;  %v671_v42 = vpop.f32.mrb[1].mxu1 }
 0x2de   : > { %v672_v43 = vadd.f32 %v671_v42, %v597_v38 }
 0x2df   : > { %v677_v44 = vadd.f32 %v670_v41, %v861_v11 }
 0x2e0   : > { %v678_v45 = vadd.f32 %v675_v40, %v672_v43 }
 0x2e2   : > { %v681_v46 = vcombine.low %v677_v44, %v678_v45 }
 0x2e4   : > { %683 = vst [vmem:[%s251_s25] sm:$0xff] %v681_v46 }
 0x2e5 PF: > { %s16_s21 = sadd.s32 1, %s791_s21  }
 0x2e6   : > { %p13_p4 = scmp.ge.s32.totalorder %s16_s21, 4  }
 0x2e8   :  { %15 = sbr.rel (!%p13_p4) target bundleno = 1 (0x1), region = 74 }

</bundles_post_ra>
